<compile_context>
chip_gen: v7x
topology: tpu7x:2x2x1
jax: 0.10.0
libtpu: 0.0.40
codegen_flags: <defaults>
</compile_context>

<pallas_src>
import functools

import jax
import jax.numpy as jnp
from jax.experimental import pallas as pl
from jax.experimental.pallas import tpu as pltpu


# ----------------------------- Pallas kernels ------------------------------ #

def _qkv_attn_kernel(x_ref, w_ref, b_ref, o_ref, *, num_heads, head_dim, scale):
    """Fused qkv 1x1-conv + per-position, per-head softmax "attention".

    x_ref: (1, C, HW)       one batch element, channels x spatial (spatial on lanes)
    w_ref: (3C, C)          qkv conv weight (1x1 kernel squeezed)
    b_ref: (3C, 1)          qkv conv bias
    o_ref: (1, nH, HW, hd)  attention output, stored in the contiguous
                            (head, position, head_dim) order so the caller's
                            torch-style `.view(B, C, H, W)` is a free reshape.
    """
    C = num_heads * head_dim
    x = x_ref[0]                                           # (C, HW)
    # 1x1 conv == matmul; default (single-pass bf16) MXU precision, f32 accumulate.
    qkv = jnp.dot(w_ref[...], x, preferred_element_type=jnp.float32) + b_ref[...]

    for n in range(num_heads):                             # static unroll, nH is tiny
        lo = n * head_dim
        q = qkv[lo:lo + head_dim, :] * scale               # (hd, HW)
        k = qkv[C + lo:C + lo + head_dim, :]
        v = qkv[2 * C + lo:2 * C + lo + head_dim, :]

        # torch.einsum('bnhw,bnhw->bnhw', q, k) is a pure elementwise product.
        a = q * k                                          # (hd, HW)
        # Per-head softmax over head_dim (this head's sublane group).
        a = a - jnp.max(a, axis=0, keepdims=True)          # per-head max (stable)
        e = jnp.exp(a)
        denom = jnp.sum(e, axis=0, keepdims=True)          # (1, HW)
        p = e * pl.reciprocal(denom, approx=True)
        y = p * v                                          # elementwise einsum again

        # Store in (position, head_dim) order -> HBM holds the contiguous
        # (nH, HW, hd) layout that the PyTorch `.view` reinterprets.
        o_ref[0, n] = y.T.astype(o_ref.dtype)              # (HW, hd)


def _proj_kernel(x_ref, w_ref, b_ref, o_ref):
    """1x1 projection conv: (C, C) @ (C, HW) + bias, lane-dense output."""
    o_ref[0] = (jnp.dot(w_ref[...], x_ref[0], preferred_element_type=jnp.float32)
                + b_ref[...]).astype(o_ref.dtype)


# ------------------------------ Pallas wrappers ----------------------------- #

def qkv_attention_pallas(x3, w_qkv, b_qkv, num_heads, head_dim, scale):
    """x3: (B, C, H*W) -> (B, nH, H*W, hd) attention output (contiguous order)."""
    B, C, HW = x3.shape
    kernel = functools.partial(_qkv_attn_kernel, num_heads=num_heads,
                               head_dim=head_dim, scale=scale)
    return pl.pallas_call(
        kernel,
        out_shape=jax.ShapeDtypeStruct((B, num_heads, HW, head_dim), x3.dtype),
        grid=(B,),
        in_specs=[pl.BlockSpec((1, C, HW), lambda b: (b, 0, 0)),
                  pl.BlockSpec((3 * C, C), lambda b: (0, 0)),     # resident weight
                  pl.BlockSpec((3 * C, 1), lambda b: (0, 0))],    # resident bias
        out_specs=pl.BlockSpec((1, num_heads, HW, head_dim),
                               lambda b: (b, 0, 0, 0)),
        compiler_params=pltpu.CompilerParams(dimension_semantics=("parallel",)),
    )(x3, w_qkv, b_qkv.reshape(3 * C, 1))


def proj_pallas(x3, w, b):
    """x3: (B, C, H*W) scrambled activations -> (B, C, H*W) projected output."""
    B, C, HW = x3.shape
    return pl.pallas_call(
        _proj_kernel,
        out_shape=jax.ShapeDtypeStruct((B, C, HW), x3.dtype),
        grid=(B,),
        in_specs=[pl.BlockSpec((1, C, HW), lambda b: (b, 0, 0)),
                  pl.BlockSpec((C, C), lambda b: (0, 0)),
                  pl.BlockSpec((C, 1), lambda b: (0, 0))],
        out_specs=pl.BlockSpec((1, C, HW), lambda b: (b, 0, 0)),
        compiler_params=pltpu.CompilerParams(dimension_semantics=("parallel",)),
    )(x3, w, b.reshape(C, 1))


# ------------------------------ Forward path -------------------------------- #

def _nat_forward(x_nchw, qkv_w, qkv_b, proj_w, proj_b, *, num_heads, head_dim, scale):
    B, C, H, W = x_nchw.shape
    x3 = x_nchw.reshape(B, C, H * W)                       # free (row-major) reshape
    # Fused qkv 1x1-conv + per-head attention; output memory order (B, nH, HW, hd).
    att = qkv_attention_pallas(x3, qkv_w, qkv_b, num_heads, head_dim, scale)
    # PyTorch's `.view(B, C, H, W)` on the contiguous (B, nH, HW, hd) tensor is a
    # pure row-major reinterpretation -> zero-cost reshape, no transpose, no copy.
    z3 = att.reshape(B, C, H * W)
    out3 = proj_pallas(z3, proj_w, proj_b)                 # 1x1 proj conv
    return out3.reshape(B, C, H, W)                        # free


# ------------------------------ Module port --------------------------------- #

class NeighborhoodAttention:
    """JAX/Pallas port of the PyTorch NeighborhoodAttention module (inference)."""

    def __init__(self, input_size, dim, num_heads, window_size=7, qkv_bias=True,
                 qk_scale=None, attn_drop=0.0, proj_drop=0.0, key=None):
        assert qkv_bias, "this port initializes the qkv bias (module default)"
        self.window_size = window_size
        self.num_heads = num_heads
        self.head_dim = dim // num_heads
        self.scale = float(qk_scale or self.head_dim ** (-0.5))
        self.H, self.W = input_size
        ws = 2 * (window_size // 2) + 1

        key = jax.random.PRNGKey(0) if key is None else key
        k1, k2, k3, k4, k5 = jax.random.split(key, 5)
        # Deterministic synthetic params (same shapes as nn.Conv2d 1x1 weights, squeezed).
        self.qkv_w = jax.random.normal(k1, (3 * dim, dim), jnp.float32) * 0.05
        self.qkv_b = jax.random.normal(k2, (3 * dim,), jnp.float32) * 0.05
        self.proj_w = jax.random.normal(k3, (dim, dim), jnp.float32) * 0.05
        self.proj_b = jax.random.normal(k4, (dim,), jnp.float32) * 0.05
        # trunc_normal_(std=0.02) analogue; kept only for shape parity (see TODO below).
        self.relative_bias = (jax.random.truncated_normal(
            k5, -2.0, 2.0, (num_heads, ws, ws)) * 0.02).astype(jnp.float32)
        # attn_drop / proj_drop default to p=0.0 -> identity at inference.
        # pad_idx (ReplicationPad2d) is never used in the reference forward.

        self._fwd = jax.jit(functools.partial(
            _nat_forward, num_heads=self.num_heads, head_dim=self.head_dim,
            scale=self.scale))

    def forward(self, x_nchw):
        # TODO(synk): the reference's `relative_bias.expand(1, nH, H*W, H*W)` on a
        # 5-D (1, nH, 1, ws, ws) tensor raises a RuntimeError in PyTorch, so the
        # bias-add has no defined semantics and is omitted here (matches reference).
        return self._fwd(x_nchw, self.qkv_w, self.qkv_b, self.proj_w, self.proj_b)

    __call__ = forward


# ------------------------------ Reference (pure JAX) ------------------------ #

def reference_forward(x, mod: NeighborhoodAttention):
    B, C, H, W = x.shape
    nH, hd = mod.num_heads, mod.head_dim
    hp = jax.lax.Precision.HIGHEST
    qkv = jnp.einsum('bchw,oc->bohw', x, mod.qkv_w, precision=hp) \
        + mod.qkv_b[None, :, None, None]
    qkv = qkv.reshape(B, 3, nH, hd, H * W).transpose(1, 0, 2, 4, 3)   # (3,B,nH,HW,hd)
    q, k, v = qkv[0] * mod.scale, qkv[1], qkv[2]
    attn = q * k                                                      # elementwise einsum
    attn = jax.nn.softmax(attn, axis=-1)                              # over head_dim
    y = (attn * v).reshape(B, C, H, W)                                # torch .view scramble
    out = jnp.einsum('bchw,oc->bohw', y, mod.proj_w, precision=hp) \
        + mod.proj_b[None, :, None, None]
    return out


# ---------------------------------- main ------------------------------------ #

if __name__ == "__main__":
    B, C, H, W = 2, 32, 16, 16
    num_heads = 4

    mod = NeighborhoodAttention((H, W), dim=C, num_heads=num_heads, window_size=7,
                                key=jax.random.PRNGKey(0))
    x = jax.random.normal(jax.random.PRNGKey(1), (B, C, H, W), jnp.float32)

    out = jax.block_until_ready(mod(x))
    ref = jax.block_until_ready(reference_forward(x, mod))

    assert out.shape == (B, C, H, W), out.shape
    # Kernel matmuls run at default (single-pass bf16) MXU precision per the perf
    # guidance; the reference runs at HIGHEST, so allow ~1e-2 slack.
    assert jnp.allclose(out, ref, rtol=1e-2, atol=1e-2), \
        f"max abs err = {jnp.max(jnp.abs(out - ref))}"

    print("KERNEL_OK")
</pallas_src>

<mosaic_0001>
module attributes {stable_mosaic.version = 11 : i64} {
  func.func @_qkv_attn_kernel(%arg0: i32, %arg1: memref<1x32x256xf32, #tpu.memory_space<vmem>>, %arg2: memref<96x32xf32, #tpu.memory_space<vmem>>, %arg3: memref<96x1xf32, #tpu.memory_space<vmem>>, %arg4: memref<1x4x256x8xf32, #tpu.memory_space<vmem>>) attributes {dimension_semantics = [#tpu.dimension_semantics<parallel>], iteration_bounds = array<i64: 2>, scalar_prefetch = 0 : i64, scratch_operands = 0 : i64, tpu.core_type = #tpu.core_type<tc>, window_params = [{transform_indices = @transform_0, window_bounds = array<i64: 1, 32, 256>}, {pipeline_mode = #tpu.pipeline_mode<synchronous>, transform_indices = @transform_1, window_bounds = array<i64: 96, 32>}, {pipeline_mode = #tpu.pipeline_mode<synchronous>, transform_indices = @transform_2, window_bounds = array<i64: 96, 1>}, {transform_indices = @transform_3, window_bounds = array<i64: 1, 4, 256, 8>}]} {
    %c0 = arith.constant 0 : index
    %c0_0 = arith.constant 0 : index
    %c0_1 = arith.constant 0 : index
    %0 = vector.load %arg1[%c0, %c0_0, %c0_1] : memref<1x32x256xf32, #tpu.memory_space<vmem>>, vector<1x32x256xf32>
    %1 = vector.shape_cast %0 : vector<1x32x256xf32> to vector<32x256xf32>
    %c0_2 = arith.constant 0 : index
    %c0_3 = arith.constant 0 : index
    %2 = vector.load %arg2[%c0_2, %c0_3] : memref<96x32xf32, #tpu.memory_space<vmem>>, vector<96x32xf32>
    %cst = arith.constant dense<0.000000e+00> : vector<96x256xf32>
    %3 = tpu.matmul %2, %1, %cst {dimension_numbers = #tpu.dot_dimension_numbers<[1], [0], [0], [1], [0, 0, 1, 1], [], []>} : vector<96x32xf32>, vector<32x256xf32>, vector<96x256xf32> -> vector<96x256xf32>
    %c0_4 = arith.constant 0 : index
    %c0_5 = arith.constant 0 : index
    %4 = vector.load %arg3[%c0_4, %c0_5] : memref<96x1xf32, #tpu.memory_space<vmem>>, vector<96x1xf32>
    %5 = vector.broadcast %4 : vector<96x1xf32> to vector<96x256xf32>
    %6 = arith.addf %3, %5 : vector<96x256xf32>
    %7 = vector.extract_strided_slice %6 {offsets = [0, 0], sizes = [8, 256], strides = [1, 1]} : vector<96x256xf32> to vector<8x256xf32>
    %cst_6 = arith.constant 0.353553385 : f32
    %8 = vector.broadcast %cst_6 : f32 to vector<8x256xf32>
    %9 = arith.mulf %7, %8 : vector<8x256xf32>
    %10 = vector.extract_strided_slice %6 {offsets = [32, 0], sizes = [8, 256], strides = [1, 1]} : vector<96x256xf32> to vector<8x256xf32>
    %11 = vector.extract_strided_slice %6 {offsets = [64, 0], sizes = [8, 256], strides = [1, 1]} : vector<96x256xf32> to vector<8x256xf32>
    %12 = arith.mulf %9, %10 : vector<8x256xf32>
    %cst_7 = arith.constant dense<0xFF800000> : vector<256xf32>
    %13 = vector.multi_reduction <maximumf>, %12, %cst_7 [0] : vector<8x256xf32> to vector<256xf32>
    %14 = vector.shape_cast %13 : vector<256xf32> to vector<1x256xf32>
    %15 = vector.broadcast %14 : vector<1x256xf32> to vector<8x256xf32>
    %16 = arith.subf %12, %15 : vector<8x256xf32>
    %17 = math.exp %16 : vector<8x256xf32>
    %cst_8 = arith.constant dense<0.000000e+00> : vector<256xf32>
    %18 = vector.multi_reduction <add>, %17, %cst_8 [0] : vector<8x256xf32> to vector<256xf32>
    %19 = vector.shape_cast %18 : vector<256xf32> to vector<1x256xf32>
    %20 = tpu.reciprocal %19 {approx = true} : vector<1x256xf32> -> vector<1x256xf32>
    %21 = vector.broadcast %20 : vector<1x256xf32> to vector<8x256xf32>
    %22 = arith.mulf %17, %21 : vector<8x256xf32>
    %23 = arith.mulf %22, %11 : vector<8x256xf32>
    %24 = tpu.transpose %23, [1, 0] : vector<8x256xf32> -> vector<256x8xf32>
    %c0_9 = arith.constant 0 : index
    %c0_10 = arith.constant 0 : index
    %c0_11 = arith.constant 0 : index
    %c0_12 = arith.constant 0 : index
    %25 = vector.load %arg4[%c0_9, %c0_10, %c0_11, %c0_12] : memref<1x4x256x8xf32, #tpu.memory_space<vmem>>, vector<1x1x256x8xf32>
    %26 = vector.shape_cast %25 : vector<1x1x256x8xf32> to vector<256x8xf32>
    %27 = vector.shape_cast %24 : vector<256x8xf32> to vector<1x1x256x8xf32>
    tpu.vector_store %arg4[%c0_9, %c0_10, %c0_11, %c0_12], %27 {strides = array<i32>} : memref<1x4x256x8xf32, #tpu.memory_space<vmem>>, vector<1x1x256x8xf32>,
    %28 = vector.extract_strided_slice %6 {offsets = [8, 0], sizes = [8, 256], strides = [1, 1]} : vector<96x256xf32> to vector<8x256xf32>
    %cst_13 = arith.constant 0.353553385 : f32
    %29 = vector.broadcast %cst_13 : f32 to vector<8x256xf32>
    %30 = arith.mulf %28, %29 : vector<8x256xf32>
    %31 = vector.extract_strided_slice %6 {offsets = [40, 0], sizes = [8, 256], strides = [1, 1]} : vector<96x256xf32> to vector<8x256xf32>
    %32 = vector.extract_strided_slice %6 {offsets = [72, 0], sizes = [8, 256], strides = [1, 1]} : vector<96x256xf32> to vector<8x256xf32>
    %33 = arith.mulf %30, %31 : vector<8x256xf32>
    %cst_14 = arith.constant dense<0xFF800000> : vector<256xf32>
    %34 = vector.multi_reduction <maximumf>, %33, %cst_14 [0] : vector<8x256xf32> to vector<256xf32>
    %35 = vector.shape_cast %34 : vector<256xf32> to vector<1x256xf32>
    %36 = vector.broadcast %35 : vector<1x256xf32> to vector<8x256xf32>
    %37 = arith.subf %33, %36 : vector<8x256xf32>
    %38 = math.exp %37 : vector<8x256xf32>
    %cst_15 = arith.constant dense<0.000000e+00> : vector<256xf32>
    %39 = vector.multi_reduction <add>, %38, %cst_15 [0] : vector<8x256xf32> to vector<256xf32>
    %40 = vector.shape_cast %39 : vector<256xf32> to vector<1x256xf32>
    %41 = tpu.reciprocal %40 {approx = true} : vector<1x256xf32> -> vector<1x256xf32>
    %42 = vector.broadcast %41 : vector<1x256xf32> to vector<8x256xf32>
    %43 = arith.mulf %38, %42 : vector<8x256xf32>
    %44 = arith.mulf %43, %32 : vector<8x256xf32>
    %45 = tpu.transpose %44, [1, 0] : vector<8x256xf32> -> vector<256x8xf32>
    %c0_16 = arith.constant 0 : index
    %c1 = arith.constant 1 : index
    %c0_17 = arith.constant 0 : index
    %c0_18 = arith.constant 0 : index
    %46 = vector.load %arg4[%c0_16, %c1, %c0_17, %c0_18] : memref<1x4x256x8xf32, #tpu.memory_space<vmem>>, vector<1x1x256x8xf32>
    %47 = vector.shape_cast %46 : vector<1x1x256x8xf32> to vector<256x8xf32>
    %48 = vector.shape_cast %45 : vector<256x8xf32> to vector<1x1x256x8xf32>
    tpu.vector_store %arg4[%c0_16, %c1, %c0_17, %c0_18], %48 {strides = array<i32>} : memref<1x4x256x8xf32, #tpu.memory_space<vmem>>, vector<1x1x256x8xf32>,
    %49 = vector.extract_strided_slice %6 {offsets = [16, 0], sizes = [8, 256], strides = [1, 1]} : vector<96x256xf32> to vector<8x256xf32>
    %cst_19 = arith.constant 0.353553385 : f32
    %50 = vector.broadcast %cst_19 : f32 to vector<8x256xf32>
    %51 = arith.mulf %49, %50 : vector<8x256xf32>
    %52 = vector.extract_strided_slice %6 {offsets = [48, 0], sizes = [8, 256], strides = [1, 1]} : vector<96x256xf32> to vector<8x256xf32>
    %53 = vector.extract_strided_slice %6 {offsets = [80, 0], sizes = [8, 256], strides = [1, 1]} : vector<96x256xf32> to vector<8x256xf32>
    %54 = arith.mulf %51, %52 : vector<8x256xf32>
    %cst_20 = arith.constant dense<0xFF800000> : vector<256xf32>
    %55 = vector.multi_reduction <maximumf>, %54, %cst_20 [0] : vector<8x256xf32> to vector<256xf32>
    %56 = vector.shape_cast %55 : vector<256xf32> to vector<1x256xf32>
    %57 = vector.broadcast %56 : vector<1x256xf32> to vector<8x256xf32>
    %58 = arith.subf %54, %57 : vector<8x256xf32>
    %59 = math.exp %58 : vector<8x256xf32>
    %cst_21 = arith.constant dense<0.000000e+00> : vector<256xf32>
    %60 = vector.multi_reduction <add>, %59, %cst_21 [0] : vector<8x256xf32> to vector<256xf32>
    %61 = vector.shape_cast %60 : vector<256xf32> to vector<1x256xf32>
    %62 = tpu.reciprocal %61 {approx = true} : vector<1x256xf32> -> vector<1x256xf32>
    %63 = vector.broadcast %62 : vector<1x256xf32> to vector<8x256xf32>
    %64 = arith.mulf %59, %63 : vector<8x256xf32>
    %65 = arith.mulf %64, %53 : vector<8x256xf32>
    %66 = tpu.transpose %65, [1, 0] : vector<8x256xf32> -> vector<256x8xf32>
    %c0_22 = arith.constant 0 : index
    %c2 = arith.constant 2 : index
    %c0_23 = arith.constant 0 : index
    %c0_24 = arith.constant 0 : index
    %67 = vector.load %arg4[%c0_22, %c2, %c0_23, %c0_24] : memref<1x4x256x8xf32, #tpu.memory_space<vmem>>, vector<1x1x256x8xf32>
    %68 = vector.shape_cast %67 : vector<1x1x256x8xf32> to vector<256x8xf32>
    %69 = vector.shape_cast %66 : vector<256x8xf32> to vector<1x1x256x8xf32>
    tpu.vector_store %arg4[%c0_22, %c2, %c0_23, %c0_24], %69 {strides = array<i32>} : memref<1x4x256x8xf32, #tpu.memory_space<vmem>>, vector<1x1x256x8xf32>,
    %70 = vector.extract_strided_slice %6 {offsets = [24, 0], sizes = [8, 256], strides = [1, 1]} : vector<96x256xf32> to vector<8x256xf32>
    %cst_25 = arith.constant 0.353553385 : f32
    %71 = vector.broadcast %cst_25 : f32 to vector<8x256xf32>
    %72 = arith.mulf %70, %71 : vector<8x256xf32>
    %73 = vector.extract_strided_slice %6 {offsets = [56, 0], sizes = [8, 256], strides = [1, 1]} : vector<96x256xf32> to vector<8x256xf32>
    %74 = vector.extract_strided_slice %6 {offsets = [88, 0], sizes = [8, 256], strides = [1, 1]} : vector<96x256xf32> to vector<8x256xf32>
    %75 = arith.mulf %72, %73 : vector<8x256xf32>
    %cst_26 = arith.constant dense<0xFF800000> : vector<256xf32>
    %76 = vector.multi_reduction <maximumf>, %75, %cst_26 [0] : vector<8x256xf32> to vector<256xf32>
    %77 = vector.shape_cast %76 : vector<256xf32> to vector<1x256xf32>
    %78 = vector.broadcast %77 : vector<1x256xf32> to vector<8x256xf32>
    %79 = arith.subf %75, %78 : vector<8x256xf32>
    %80 = math.exp %79 : vector<8x256xf32>
    %cst_27 = arith.constant dense<0.000000e+00> : vector<256xf32>
    %81 = vector.multi_reduction <add>, %80, %cst_27 [0] : vector<8x256xf32> to vector<256xf32>
    %82 = vector.shape_cast %81 : vector<256xf32> to vector<1x256xf32>
    %83 = tpu.reciprocal %82 {approx = true} : vector<1x256xf32> -> vector<1x256xf32>
    %84 = vector.broadcast %83 : vector<1x256xf32> to vector<8x256xf32>
    %85 = arith.mulf %80, %84 : vector<8x256xf32>
    %86 = arith.mulf %85, %74 : vector<8x256xf32>
    %87 = tpu.transpose %86, [1, 0] : vector<8x256xf32> -> vector<256x8xf32>
    %c0_28 = arith.constant 0 : index
    %c3 = arith.constant 3 : index
    %c0_29 = arith.constant 0 : index
    %c0_30 = arith.constant 0 : index
    %88 = vector.load %arg4[%c0_28, %c3, %c0_29, %c0_30] : memref<1x4x256x8xf32, #tpu.memory_space<vmem>>, vector<1x1x256x8xf32>
    %89 = vector.shape_cast %88 : vector<1x1x256x8xf32> to vector<256x8xf32>
    %90 = vector.shape_cast %87 : vector<256x8xf32> to vector<1x1x256x8xf32>
    tpu.vector_store %arg4[%c0_28, %c3, %c0_29, %c0_30], %90 {strides = array<i32>} : memref<1x4x256x8xf32, #tpu.memory_space<vmem>>, vector<1x1x256x8xf32>,
    return
  }
  func.func @transform_0(%arg0: i32) -> (i32, i32, i32) {
    %c0_i32 = arith.constant 0 : i32
    %c0_i32_0 = arith.constant 0 : i32
    %c0_i32_1 = arith.constant 0 : i32
    return %arg0, %c0_i32, %c0_i32_0 : i32, i32, i32
  }
  func.func @transform_1(%arg0: i32) -> (i32, i32) {
    %c0_i32 = arith.constant 0 : i32
    %c0_i32_0 = arith.constant 0 : i32
    %c0_i32_1 = arith.constant 0 : i32
    return %c0_i32, %c0_i32_0 : i32, i32
  }
  func.func @transform_2(%arg0: i32) -> (i32, i32) {
    %c0_i32 = arith.constant 0 : i32
    %c0_i32_0 = arith.constant 0 : i32
    %c0_i32_1 = arith.constant 0 : i32
    return %c0_i32, %c0_i32_0 : i32, i32
  }
  func.func @transform_3(%arg0: i32) -> (i32, i32, i32, i32) {
    %c0_i32 = arith.constant 0 : i32
    %c0_i32_0 = arith.constant 0 : i32
    %c0_i32_1 = arith.constant 0 : i32
    %c0_i32_2 = arith.constant 0 : i32
    return %arg0, %c0_i32, %c0_i32_0, %c0_i32_1 : i32, i32, i32, i32
  }
}

module attributes {stable_mosaic.version = 11 : i64} {
  func.func @_proj_kernel(%arg0: i32, %arg1: memref<1x32x256xf32, #tpu.memory_space<vmem>>, %arg2: memref<32x32xf32, #tpu.memory_space<vmem>>, %arg3: memref<32x1xf32, #tpu.memory_space<vmem>>, %arg4: memref<1x32x256xf32, #tpu.memory_space<vmem>>) attributes {dimension_semantics = [#tpu.dimension_semantics<parallel>], iteration_bounds = array<i64: 2>, scalar_prefetch = 0 : i64, scratch_operands = 0 : i64, tpu.core_type = #tpu.core_type<tc>, window_params = [{transform_indices = @transform_0, window_bounds = array<i64: 1, 32, 256>}, {pipeline_mode = #tpu.pipeline_mode<synchronous>, transform_indices = @transform_1, window_bounds = array<i64: 32, 32>}, {pipeline_mode = #tpu.pipeline_mode<synchronous>, transform_indices = @transform_2, window_bounds = array<i64: 32, 1>}, {transform_indices = @transform_3, window_bounds = array<i64: 1, 32, 256>}]} {
    %c0 = arith.constant 0 : index
    %c0_0 = arith.constant 0 : index
    %0 = vector.load %arg2[%c0, %c0_0] : memref<32x32xf32, #tpu.memory_space<vmem>>, vector<32x32xf32>
    %c0_1 = arith.constant 0 : index
    %c0_2 = arith.constant 0 : index
    %c0_3 = arith.constant 0 : index
    %1 = vector.load %arg1[%c0_1, %c0_2, %c0_3] : memref<1x32x256xf32, #tpu.memory_space<vmem>>, vector<1x32x256xf32>
    %2 = vector.shape_cast %1 : vector<1x32x256xf32> to vector<32x256xf32>
    %cst = arith.constant dense<0.000000e+00> : vector<32x256xf32>
    %3 = tpu.matmul %0, %2, %cst {dimension_numbers = #tpu.dot_dimension_numbers<[1], [0], [0], [1], [0, 0, 1, 1], [], []>} : vector<32x32xf32>, vector<32x256xf32>, vector<32x256xf32> -> vector<32x256xf32>
    %c0_4 = arith.constant 0 : index
    %c0_5 = arith.constant 0 : index
    %4 = vector.load %arg3[%c0_4, %c0_5] : memref<32x1xf32, #tpu.memory_space<vmem>>, vector<32x1xf32>
    %5 = vector.broadcast %4 : vector<32x1xf32> to vector<32x256xf32>
    %6 = arith.addf %3, %5 : vector<32x256xf32>
    %c0_6 = arith.constant 0 : index
    %c0_7 = arith.constant 0 : index
    %c0_8 = arith.constant 0 : index
    %7 = vector.load %arg4[%c0_6, %c0_7, %c0_8] : memref<1x32x256xf32, #tpu.memory_space<vmem>>, vector<1x32x256xf32>
    %8 = vector.shape_cast %7 : vector<1x32x256xf32> to vector<32x256xf32>
    %9 = vector.shape_cast %6 : vector<32x256xf32> to vector<1x32x256xf32>
    tpu.vector_store %arg4[%c0_6, %c0_7, %c0_8], %9 {strides = array<i32>} : memref<1x32x256xf32, #tpu.memory_space<vmem>>, vector<1x32x256xf32>,
    return
  }
  func.func @transform_0(%arg0: i32) -> (i32, i32, i32) {
    %c0_i32 = arith.constant 0 : i32
    %c0_i32_0 = arith.constant 0 : i32
    %c0_i32_1 = arith.constant 0 : i32
    return %arg0, %c0_i32, %c0_i32_0 : i32, i32, i32
  }
  func.func @transform_1(%arg0: i32) -> (i32, i32) {
    %c0_i32 = arith.constant 0 : i32
    %c0_i32_0 = arith.constant 0 : i32
    %c0_i32_1 = arith.constant 0 : i32
    return %c0_i32, %c0_i32_0 : i32, i32
  }
  func.func @transform_2(%arg0: i32) -> (i32, i32) {
    %c0_i32 = arith.constant 0 : i32
    %c0_i32_0 = arith.constant 0 : i32
    %c0_i32_1 = arith.constant 0 : i32
    return %c0_i32, %c0_i32_0 : i32, i32
  }
  func.func @transform_3(%arg0: i32) -> (i32, i32, i32) {
    %c0_i32 = arith.constant 0 : i32
    %c0_i32_0 = arith.constant 0 : i32
    %c0_i32_1 = arith.constant 0 : i32
    return %arg0, %c0_i32, %c0_i32_0 : i32, i32, i32
  }
}

</mosaic_0001>

<bundles_post_ra>
// kernel: _nat_forward.3
= control target key start
LH: loop header
LB: loop body
LE: loop exit
PB: predicated region body
PF: predicated region fallthrough
CT: control target
= control target key end

     0   :  { %s443_s12 = smov 0   ;;  %s491_s0 = inlined_call_operand.vmem [shape: f32[2,32,256], index: 0, kind: input, shape index: {}]   ;;  %s492_s1 = inlined_call_operand.vmem [shape: f32[32,32], index: 1, kind: input, shape index: {}]   ;;  %s493_s2 = inlined_call_operand.vmem [shape: f32[32,1], index: 2, kind: input, shape index: {}]   ;;  %s494_s3 = inlined_call_operand.vmem [shape: f32[2,32,256], index: 3, kind: output, shape index: {}]  }
   0x1 LB: > { %s372_s13 = sadd.s32 4294967295, %s419_s12   ;;  %p376_p0 = scmp.ge.s32.totalorder %s419_s12, 1  ;;  %s419_s12 = sphi %s443_s12, %s13_s12  }
   0x2   : > { %p137_p1 = scmp.lt.s32.totalorder %s419_s12, 3 }
   0x4   : > { %p138_p2 = pnand %p376_p0, %p137_p1 }
   0x5   : > { %p161_p3 = scmp.lt.s32.totalorder (!%p138_p2), %s372_s13, 1  ;;  %v421_v0 = vmov (!%p138_p2), 0.0   ;;  %v185_v1 = vld [vmem:[%s493_s2 + $0x10] sm:$0xff] (!%p138_p2)  ;;  %v183_v2 = vld [vmem:[%s493_s2] sm:$0xff] (!%p138_p2)  ;;  %v422_v3 = vmov (!%p138_p2), 0   ;;  %v186_v4 = vld [vmem:[%s493_s2 + $0x18] sm:$0xff] (!%p138_p2) }
   0x6   : > { %141 = sbr.rel (%p138_p2) target bundleno = 247 (0xf7), region = 32  ;;  %284 = vmatprep.mubr.f32.mxu0 (!%p138_p2), %v421_v0  ;;  %296 = vmatprep.mubr.f32.mxu1 (!%p138_p2), %v421_v0  ;;  %v184_v5 = vld [vmem:[%s493_s2 + $0x8] sm:$0xff] (!%p138_p2)  ;;  %v171_v18 = vld [vmem:[%s492_s1] sm:$0xff] (!%p138_p2)  ;;  %vm207_vm0 = vcmask (!%p138_p2), 261120   ;;  %v173_v19 = vld [vmem:[%s492_s1 + $0x10] sm:$0xff] (!%p138_p2) }
   0x7   : > { %412 = vset.pattern.permute.xlu1 (!%p138_p2), %v422_v3  ;;  %411 = vset.pattern.permute.xlu0 (!%p138_p2), %v422_v3  ;;  %v172_v20 = vld [vmem:[%s492_s1 + $0x8] sm:$0xff] (!%p138_p2)  ;;  %v174_v21 = vld [vmem:[%s492_s1 + $0x18] sm:$0xff] (!%p138_p2) }
   0x8   : > { %199 = vperm.xlu1 (!%p138_p2), %412, %v185_v1   ;;  %189 = vperm.xlu0 (!%p138_p2), %411, %v183_v2  }
   0xc   : > { %204 = vperm.xlu1 (!%p138_p2), %412, %v186_v4   ;;  %194 = vperm.xlu0 (!%p138_p2), %411, %v184_v5  }
   0xd   : > { %s496_s13 = smov (!%p161_p3, %s372_s13), 1 }
   0xe   : > { %s387_s18 = sshll.u32 %s496_s13, 6 }
   0xf   : > { %s165_s25 = scalar_lea.vmem %s491_s0, %s387_s18  ;;  %s170_s9 = scalar_lea.vmem %s494_s3, %s387_s18 }
  0x10   : > { %v176_v6 = vld [vmem:[%s165_s25 + $0x8] sm:$0xff]  ;;  %v178_v7 = vld [vmem:[%s165_s25 + $0x18] sm:$0xff]  ;;  %v175_v8 = vld [vmem:[%s165_s25] sm:$0xff] }
  0x11   : > { %v389_v9 = vpack.c.bf16 %v178_v7, %v176_v6  ;;  %v177_v10 = vld [vmem:[%s165_s25 + $0x10] sm:$0xff]  ;;  %v180_v11 = vld [vmem:[%s165_s25 + $0x28] sm:$0xff]  ;;  %v182_v12 = vld [vmem:[%s165_s25 + $0x38] sm:$0xff] }
  0x12   : > { %v391_v13 = vpack.c.bf16 %v177_v10, %v175_v8  ;;  %v393_v14 = vpack.c.bf16 %v182_v12, %v180_v11  ;;  %v179_v15 = vld [vmem:[%s165_s25 + $0x20] sm:$0xff]  ;;  %v181_v16 = vld [vmem:[%s165_s25 + $0x30] sm:$0xff] }
  0x13   : > { %390 = vmatprep.subr.bf16.mxu0 %v389_v9  ;;  %397 = vmatprep.subr.bf16.mxu1 %v389_v9  ;;  %v395_v17 = vpack.c.bf16 %v181_v16, %v179_v15 }
  0x14   : > { %392 = vmatpush1.bf16.msra.mxu0 %v391_v13  ;;  %399 = vmatpush1.bf16.msra.mxu1 %v391_v13 }
  0x15   : > { %394 = vmatprep.subr.bf16.mxu0 %v393_v14  ;;  %398 = vmatprep.subr.bf16.mxu1 %v393_v14 }
  0x18   : > { %396 = vmatpush1.bf16.msra.mxu0 %v395_v17  ;;  %400 = vmatpush1.bf16.msra.mxu1 %v395_v17 }
  0x1b   : > { %381 = vmatmul.mubr.msk.f32.vlgmr.msra.gmra.mrb[0].mxu0 %vm207_vm0, %v171_v18  ;;  %383 = vmatmul.mubr.msk.f32.vlgmr.msra.gmra.mrb[0].mxu1 %vm207_vm0, %v173_v19 }
  0x1c   : > { %290 = vmatprep.mubr.f32.mxu0 %v421_v0  ;;  %302 = vmatprep.mubr.f32.mxu1 %v421_v0 }
  0x1f   : > { %382 = vmatmul.mubr.msk.f32.gmra.mrb[2].mxu0 %vm207_vm0, %v172_v20  ;;  %384 = vmatmul.mubr.msk.f32.gmra.mrb[2].mxu1 %vm207_vm0, %v174_v21 }
  0x87   : > { %v200_v22 = vpop.permute.xlu1 %199  ;;  %v190_v23 = vpop.permute.xlu0 %189 }
  0x8b   : > { %v205_v32 = vpop.permute.xlu1 %204  ;;  %v195_v33 = vpop.permute.xlu0 %194 }
  0xee   : > { %v286_v24 = vpop.f32.mrb[0].mxu0  ;;  %v298_v25 = vpop.f32.mrb[0].mxu1 }
  0xef   : > { %v287_v26 = vadd.f32 %v286_v24, %v190_v23  ;;  %v299_v27 = vadd.f32 %v298_v25, %v200_v22  ;;  %v288_v28 = vpop.f32.mrb[1].mxu0  ;;  %v300_v29 = vpop.f32.mrb[1].mxu1 }
  0xf0   : > { %v289_v30 = vadd.f32 %v288_v28, %v190_v23  ;;  %v301_v31 = vadd.f32 %v300_v29, %v200_v22 }
  0xf1   : > { %309 = vst [vmem:[%s170_s9] sm:$0xff] %v287_v26  ;;  %313 = vst [vmem:[%s170_s9 + $0x20] sm:$0xff] %v299_v27 }
  0xf2   : > { %310 = vst [vmem:[%s170_s9 + $0x8] sm:$0xff] %v289_v30  ;;  %314 = vst [vmem:[%s170_s9 + $0x28] sm:$0xff] %v301_v31  ;;  %v292_v34 = vpop.f32.mrb[2].mxu0  ;;  %v304_v35 = vpop.f32.mrb[2].mxu1 }
  0xf3   : > { %v293_v36 = vadd.f32 %v292_v34, %v195_v33  ;;  %v305_v37 = vadd.f32 %v304_v35, %v205_v32  ;;  %v294_v38 = vpop.f32.mrb[3].mxu0  ;;  %v306_v39 = vpop.f32.mrb[3].mxu1 }
  0xf4   : > { %v295_v40 = vadd.f32 %v294_v38, %v195_v33  ;;  %v307_v41 = vadd.f32 %v306_v39, %v205_v32 }
  0xf5   : > { %311 = vst [vmem:[%s170_s9 + $0x10] sm:$0xff] %v293_v36  ;;  %315 = vst [vmem:[%s170_s9 + $0x30] sm:$0xff] %v305_v37 }
  0xf6   : > { %312 = vst [vmem:[%s170_s9 + $0x18] sm:$0xff] %v295_v40  ;;  %316 = vst [vmem:[%s170_s9 + $0x38] sm:$0xff] %v307_v41 }
  0xf7 PF: > { %s13_s12 = sadd.s32 1, %s419_s12  }
  0xf8   : > { %p10_p4 = scmp.ge.s32.totalorder %s13_s12, 4  }
  0xfa   :  { %12 = sbr.rel (!%p10_p4) target bundleno = 1 (0x1), region = 62 }

// kernel: _nat_forward.2
= control target key start
LH: loop header
LB: loop body
LE: loop exit
PB: predicated region body
PF: predicated region fallthrough
CT: control target
= control target key end

     0   :  { %s1247_s12 = smov 0   ;;  %s1726_s0 = inlined_call_operand.vmem [shape: f32[2,32,256], index: 0, kind: input, shape index: {}]   ;;  %s1727_s1 = inlined_call_operand.vmem [shape: f32[96,32], index: 1, kind: input, shape index: {}]   ;;  %s1728_s2 = inlined_call_operand.vmem [shape: f32[96,1], index: 2, kind: input, shape index: {}]   ;;  %s1729_s3 = inlined_call_operand.vmem [shape: f32[2,4,256,8], index: 3, kind: output, shape index: {}]  }
   0x1 LB: > { %s1040_s13 = sadd.s32 4294967295, %s1223_s12   ;;  %p1044_p0 = scmp.ge.s32.totalorder %s1223_s12, 1  ;;  %s1223_s12 = sphi %s1247_s12, %s13_s12  }
   0x2   : > { %p137_p1 = scmp.lt.s32.totalorder %s1223_s12, 3 }
   0x4   : > { %p138_p2 = pnand %p1044_p0, %p137_p1 }
   0x5   : > { %p161_p3 = scmp.lt.s32.totalorder (!%p138_p2), %s1040_s13, 1  ;;  %v1225_v0 = vmov (!%p138_p2), 0.0   ;;  %v1226_v1 = vmov (!%p138_p2), 0   ;;  %v191_v2 = vld [vmem:[%s1728_s2] sm:$0xff] (!%p138_p2)  ;;  %v193_v3 = vld [vmem:[%s1728_s2 + $0x10] sm:$0xff] (!%p138_p2)  ;;  %v192_v15 = vld [vmem:[%s1728_s2 + $0x8] sm:$0xff] (!%p138_p2) }
   0x6   : > { %141 = sbr.rel (%p138_p2) target bundleno = 690 (0x2b2), region = 32  ;;  %364 = vmatprep.mubr.f32.mxu0 (!%p138_p2), %v1225_v0  ;;  %400 = vmatprep.mubr.f32.mxu1 (!%p138_p2), %v1225_v0  ;;  %v194_v16 = vld [vmem:[%s1728_s2 + $0x18] sm:$0xff] (!%p138_p2)  ;;  %v195_v18 = vld [vmem:[%s1728_s2 + $0x20] sm:$0xff] (!%p138_p2)  ;;  %v196_v19 = vld [vmem:[%s1728_s2 + $0x28] sm:$0xff] (!%p138_p2)  ;;  %vm263_vm0 = vcmask (!%p138_p2), 261120   ;;  %vm541_vm1 = vcmask (!%p138_p2), 64512  }
   0x7   : > { %1183 = vset.pattern.permute.xlu0 (!%p138_p2), %v1226_v1  ;;  %1184 = vset.pattern.permute.xlu1 (!%p138_p2), %v1226_v1  ;;  %v179_v20 = vld [vmem:[%s1727_s1] sm:$0xff] (!%p138_p2)  ;;  %v185_v21 = vld [vmem:[%s1727_s1 + $0x30] sm:$0xff] (!%p138_p2)  ;;  %v198_v23 = vld [vmem:[%s1728_s2 + $0x38] sm:$0xff] (!%p138_p2) }
   0x8   : > { %205 = vperm.xlu0 (!%p138_p2), %1183, %v191_v2   ;;  %215 = vperm.xlu1 (!%p138_p2), %1184, %v193_v3   ;;  %v197_v22 = vld [vmem:[%s1728_s2 + $0x30] sm:$0xff] (!%p138_p2)  ;;  %v180_v24 = vld [vmem:[%s1727_s1 + $0x8] sm:$0xff] (!%p138_p2)  ;;  %v186_v25 = vld [vmem:[%s1727_s1 + $0x38] sm:$0xff] (!%p138_p2) }
   0x9   : > { %v199_v26 = vld [vmem:[%s1728_s2 + $0x40] sm:$0xff] (!%p138_p2)  ;;  %v200_v27 = vld [vmem:[%s1728_s2 + $0x48] sm:$0xff] (!%p138_p2)  ;;  %v181_v28 = vld [vmem:[%s1727_s1 + $0x10] sm:$0xff] (!%p138_p2) }
   0xa   : > { %v187_v29 = vld [vmem:[%s1727_s1 + $0x40] sm:$0xff] (!%p138_p2)  ;;  %v201_v30 = vld [vmem:[%s1728_s2 + $0x50] sm:$0xff] (!%p138_p2)  ;;  %v202_v31 = vld [vmem:[%s1728_s2 + $0x58] sm:$0xff] (!%p138_p2) }
   0xb   : > { %v182_v32 = vld [vmem:[%s1727_s1 + $0x18] sm:$0xff] (!%p138_p2)  ;;  %v188_v33 = vld [vmem:[%s1727_s1 + $0x48] sm:$0xff] (!%p138_p2)  ;;  %v183_v34 = vld [vmem:[%s1727_s1 + $0x20] sm:$0xff] (!%p138_p2) }
   0xc   : > { %210 = vperm.xlu0 (!%p138_p2), %1183, %v192_v15   ;;  %220 = vperm.xlu1 (!%p138_p2), %1184, %v194_v16   ;;  %v189_v35 = vld [vmem:[%s1727_s1 + $0x50] sm:$0xff] (!%p138_p2)  ;;  %v184_v36 = vld [vmem:[%s1727_s1 + $0x28] sm:$0xff] (!%p138_p2)  ;;  %v190_v37 = vld [vmem:[%s1727_s1 + $0x58] sm:$0xff] (!%p138_p2) }
   0xd   : > { %s1731_s13 = smov (!%p161_p3, %s1040_s13), 1 }
   0xe   : > { %s1159_s14 = sshll.u32 %s1731_s13, 6  ;;  %s1160_s16 = sshll.u32 %s1731_s13, 10 }
   0xf   : > { %s165_s19 = scalar_lea.vmem %s1726_s0, %s1159_s14 }
  0x10   : > { %v172_v4 = vld [vmem:[%s165_s19 + $0x8] sm:$0xff]  ;;  %v174_v5 = vld [vmem:[%s165_s19 + $0x18] sm:$0xff]  ;;  %v171_v6 = vld [vmem:[%s165_s19] sm:$0xff]  ;;  %225 = vperm.xlu0 %1183, %v195_v18   ;;  %230 = vperm.xlu1 %1184, %v196_v19  }
  0x11   : > { %v1161_v7 = vpack.c.bf16 %v174_v5, %v172_v4  ;;  %v173_v8 = vld [vmem:[%s165_s19 + $0x10] sm:$0xff]  ;;  %v176_v9 = vld [vmem:[%s165_s19 + $0x28] sm:$0xff]  ;;  %v178_v10 = vld [vmem:[%s165_s19 + $0x38] sm:$0xff] }
  0x12   : > { %v1163_v11 = vpack.c.bf16 %v173_v8, %v171_v6  ;;  %v1165_v12 = vpack.c.bf16 %v178_v10, %v176_v9  ;;  %v175_v13 = vld [vmem:[%s165_s19 + $0x20] sm:$0xff]  ;;  %v177_v14 = vld [vmem:[%s165_s19 + $0x30] sm:$0xff]  ;;  %s1463_s19 = scalar_lea.vmem %s1729_s3, %s1160_s16 }
  0x13   : > { %1162 = vmatprep.subr.bf16.mxu0 %v1161_v7  ;;  %1169 = vmatprep.subr.bf16.mxu1 %v1161_v7  ;;  %v1167_v17 = vpack.c.bf16 %v177_v14, %v175_v13 }
  0x14   : > { %1164 = vmatpush1.bf16.msra.mxu0 %v1163_v11  ;;  %1171 = vmatpush1.bf16.msra.mxu1 %v1163_v11 }
  0x15   : > { %1166 = vmatprep.subr.bf16.mxu0 %v1165_v12  ;;  %1170 = vmatprep.subr.bf16.mxu1 %v1165_v12 }
  0x16   : > { %235 = vperm.xlu0 %1183, %v197_v22   ;;  %240 = vperm.xlu1 %1184, %v198_v23  }
  0x18   : > { %1168 = vmatpush1.bf16.msra.mxu0 %v1167_v17  ;;  %1172 = vmatpush1.bf16.msra.mxu1 %v1167_v17 }
  0x1a   : > { %245 = vperm.xlu0 %1183, %v199_v26   ;;  %250 = vperm.xlu1 %1184, %v200_v27  }
  0x1b   : > { %1049 = vmatmul.mubr.msk.f32.vlgmr.msra.gmra.mrb[0].mxu0 %vm263_vm0, %v179_v20  ;;  %1055 = vmatmul.mubr.msk.f32.vlgmr.msra.gmra.mrb[0].mxu1 %vm263_vm0, %v185_v21 }
  0x1c   : > { %370 = vmatprep.mubr.f32.mxu0 %v1225_v0  ;;  %406 = vmatprep.mubr.f32.mxu1 %v1225_v0 }
  0x1e   : > { %255 = vperm.xlu0 %1183, %v201_v30   ;;  %260 = vperm.xlu1 %1184, %v202_v31  }
  0x1f   : > { %1050 = vmatmul.mubr.msk.f32.gmra.mrb[2].mxu0 %vm263_vm0, %v180_v24  ;;  %1056 = vmatmul.mubr.msk.f32.gmra.mrb[2].mxu1 %vm263_vm0, %v186_v25 }
  0x20   : > { %376 = vmatprep.mubr.f32.mxu0 %v1225_v0  ;;  %412 = vmatprep.mubr.f32.mxu1 %v1225_v0 }
  0x23   : > { %1051 = vmatmul.mubr.msk.f32.gmra.mrb[4].mxu0 %vm263_vm0, %v181_v28  ;;  %1057 = vmatmul.mubr.msk.f32.gmra.mrb[4].mxu1 %vm263_vm0, %v187_v29 }
  0x24   : > { %382 = vmatprep.mubr.f32.mxu0 %v1225_v0  ;;  %418 = vmatprep.mubr.f32.mxu1 %v1225_v0 }
  0x27   : > { %1052 = vmatmul.mubr.msk.f32.gmra.mrb[6].mxu0 %vm263_vm0, %v182_v32  ;;  %1058 = vmatmul.mubr.msk.f32.gmra.mrb[6].mxu1 %vm263_vm0, %v188_v33 }
  0x28   : > { %388 = vmatprep.mubr.f32.mxu0 %v1225_v0  ;;  %424 = vmatprep.mubr.f32.mxu1 %v1225_v0 }
  0x2b   : > { %1053 = vmatmul.mubr.msk.f32.gmra.mrb[8].mxu0 %vm263_vm0, %v183_v34  ;;  %1059 = vmatmul.mubr.msk.f32.gmra.mrb[8].mxu1 %vm263_vm0, %v189_v35 }
  0x2c   : > { %394 = vmatprep.mubr.f32.mxu0 %v1225_v0  ;;  %430 = vmatprep.mubr.f32.mxu1 %v1225_v0 }
  0x2f   : > { %1054 = vmatmul.mubr.msk.f32.gmra.mrb[10].mxu0 %vm263_vm0, %v184_v36  ;;  %1060 = vmatmul.mubr.msk.f32.gmra.mrb[10].mxu1 %vm263_vm0, %v190_v37 }
  0x87   : > { %v206_v38 = vpop.permute.xlu0 %205  ;;  %v216_v39 = vpop.permute.xlu1 %215 }
  0x8b   : > { %v211_v40 = vpop.permute.xlu0 %210  ;;  %v221_v41 = vpop.permute.xlu1 %220 }
  0x8f   : > { %v226_v46 = vpop.permute.xlu0 %225  ;;  %v1357_v51 = vpop.permute.xlu1 %230 }
  0x95   : > { %v236_v57 = vpop.permute.xlu0 %235  ;;  %v241_v7 = vpop.permute.xlu1 %240 }
  0xee   : > { %v366_v42 = vpop.f32.mrb[0].mxu0  ;;  %v402_v43 = vpop.f32.mrb[0].mxu1 }
  0xef   : > { %v368_v44 = vpop.f32.mrb[1].mxu0  ;;  %v404_v45 = vpop.f32.mrb[1].mxu1  ;;  %v367_v59 = vadd.f32 %v366_v42, %v206_v38  ;;  %v403_v60 = vadd.f32 %v402_v43, %v236_v57 }
  0xf0   : > { %v405_v62 = vadd.f32 %v404_v45, %v236_v57  ;;  %v369_v2 = vadd.f32 %v368_v44, %v206_v38 }
  0xf1   : > { %v437_v10 = vmul.f32 0.35355338, %v367_v59 }
  0xf2   : > { %v372_v47 = vpop.f32.mrb[2].mxu0  ;;  %v408_v48 = vpop.f32.mrb[2].mxu1  ;;  %v438_v20 = vmul.f32 0.35355338, %v369_v2 }
  0xf3   : > { %v374_v49 = vpop.f32.mrb[3].mxu0  ;;  %v410_v50 = vpop.f32.mrb[3].mxu1  ;;  %v409_v11 = vadd.f32 %v408_v48, %v241_v7  ;;  %v373_v14 = vadd.f32 %v372_v47, %v211_v40 }
  0xf4   : > { %v411_v15 = vadd.f32 %v410_v50, %v241_v7  ;;  %v375_v26 = vadd.f32 %v374_v49, %v211_v40 }
  0xf5   : > { %v574_v33 = vmul.f32 0.35355338, %v373_v14 }
  0xf6   : > { %v378_v52 = vpop.f32.mrb[4].mxu0  ;;  %v1359_v53 = vpop.f32.mrb[4].mxu1  ;;  %v575_v45 = vmul.f32 0.35355338, %v375_v26 }
  0xf7   : > { %v379_v54 = vadd.f32 %v378_v52, %v216_v39  ;;  %v380_v55 = vpop.f32.mrb[5].mxu0  ;;  %v1361_v56 = vpop.f32.mrb[5].mxu1 }
  0xf8   : > { %v381_v58 = vadd.f32 %v380_v55, %v216_v39 }
  0xf9   : > { %v711_v61 = vmul.f32 0.35355338, %v379_v54 }
  0xfa   : > { %v712_v63 = vmul.f32 0.35355338, %v381_v58  ;;  %v384_v0 = vpop.f32.mrb[6].mxu0  ;;  %v1363_v1 = vpop.f32.mrb[6].mxu1 }
  0xfb   : > { %v1365_v3 = vmul.f32 %v711_v61, %v403_v60  ;;  %v385_v4 = vadd.f32 %v384_v0, %v221_v41  ;;  %v386_v5 = vpop.f32.mrb[7].mxu0  ;;  %v1367_v6 = vpop.f32.mrb[7].mxu1 }
  0xfc   : > { %v1369_v8 = vmul.f32 %v712_v63, %v405_v62  ;;  %v387_v9 = vadd.f32 %v386_v5, %v221_v41 }
  0xfd   : > { %v715_v12 = vrot.slane %v1365_v3, 4  ;;  %v848_v13 = vmul.f32 0.35355338, %v385_v4 }
  0xfe   : > { %v721_v16 = vrot.slane %v1369_v8, 4  ;;  %v849_v17 = vmul.f32 0.35355338, %v387_v9  ;;  %v390_v18 = vpop.f32.mrb[8].mxu0  ;;  %v1373_v19 = vpop.f32.mrb[8].mxu1 }
  0xff   : > { %v716_v21 = vmax.f32 %v1365_v3, %v715_v12  ;;  %v1376_v22 = vmul.f32 %v848_v13, %v409_v11  ;;  %v391_v23 = vadd.f32 %v390_v18, %v226_v46  ;;  %v392_v24 = vpop.f32.mrb[9].mxu0  ;;  %v1378_v25 = vpop.f32.mrb[9].mxu1 }
 0x100   : > { %v722_v27 = vmax.f32 %v1369_v8, %v721_v16  ;;  %v1381_v28 = vmul.f32 %v849_v17, %v411_v15  ;;  %v393_v29 = vadd.f32 %v392_v24, %v226_v46 }
 0x101   : > { %v717_v30 = vrot.slane %v716_v21, 2  ;;  %v852_v31 = vrot.slane %v1376_v22, 4  ;;  %v1384_v32 = vmul.f32 %v437_v10, %v391_v23 }
 0x102   : > { %v723_v34 = vrot.slane %v722_v27, 2  ;;  %v858_v35 = vrot.slane %v1381_v28, 4  ;;  %v1387_v36 = vmul.f32 %v438_v20, %v393_v29  ;;  %v396_v37 = vpop.f32.mrb[10].mxu0  ;;  %v1389_v38 = vpop.f32.mrb[10].mxu1 }
 0x103   : > { %v718_v39 = vmax.f32 %v716_v21, %v717_v30  ;;  %v853_v40 = vmax.f32 %v1376_v22, %v852_v31  ;;  %v441_v41 = vrot.slane %v1384_v32, 4  ;;  %v397_v42 = vadd.f32 %v396_v37, %v1357_v51  ;;  %v398_v43 = vpop.f32.mrb[11].mxu0  ;;  %v1394_v44 = vpop.f32.mrb[11].mxu1 }
 0x104   : > { %v724_v46 = vmax.f32 %v722_v27, %v723_v34  ;;  %v859_v47 = vmax.f32 %v1381_v28, %v858_v35  ;;  %v447_v48 = vrot.slane %v1387_v36, 4  ;;  %v399_v59 = vadd.f32 %v398_v43, %v1357_v51 }
 0x105   : > { %v719_v49 = vrot.slane %v718_v39, 1  ;;  %v854_v50 = vrot.slane %v853_v40, 2  ;;  %v442_v52 = vmax.f32 %v1384_v32, %v441_v41  ;;  %v576_v54 = vmul.f32 %v574_v33, %v397_v42 }
 0x106   : > { %v725_v55 = vrot.slane %v724_v46, 1  ;;  %v860_v57 = vrot.slane %v859_v47, 2  ;;  %v448_v58 = vmax.f32 %v1387_v36, %v447_v48  ;;  %v577_v5 = vmul.f32 %v575_v45, %v399_v59 }
 0x107   : > { %v720_v60 = vmax.f32 %v718_v39, %v719_v49  ;;  %v855_v61 = vmax.f32 %v853_v40, %v854_v50  ;;  %v443_v62 = vrot.slane %v442_v52, 2  ;;  %v578_v63 = vrot.slane %v576_v54, 4 }
 0x108   : > { %v726_v0 = vmax.f32 %v724_v46, %v725_v55  ;;  %v861_v2 = vmax.f32 %v859_v47, %v860_v57  ;;  %v449_v4 = vrot.slane %v448_v58, 2  ;;  %v584_v15 = vrot.slane %v577_v5, 4 }
 0x109   : > { %v727_v7 = vsub.f32 %v1365_v3, %v720_v60  ;;  %v856_v9 = vrot.slane %v855_v61, 1  ;;  %v444_v10 = vmax.f32 %v442_v52, %v443_v62  ;;  %v579_v11 = vmax.f32 %v576_v54, %v578_v63 }
 0x10a   : > { %v728_v12 = vsub.f32 %v1369_v8, %v726_v0  ;;  %v862_v13 = vrot.slane %v861_v2, 1  ;;  %v450_v14 = vmax.f32 %v448_v58, %v449_v4  ;;  %v585_v24 = vmax.f32 %v577_v5, %v584_v15 }
 0x10b   : > { %v729_v16 = vmul.f32 1.442695, %v727_v7  ;;  %v857_v51 = vmax.f32 %v855_v61, %v856_v9  ;;  %v445_v17 = vrot.slane %v444_v10, 1  ;;  %v580_v18 = vrot.slane %v579_v11, 2 }
 0x10c   : > { %v731_v20 = vmul.f32 1.442695, %v728_v12  ;;  %v863_v21 = vmax.f32 %v861_v2, %v862_v13  ;;  %v451_v23 = vrot.slane %v450_v14, 1  ;;  %v586_v30 = vrot.slane %v585_v24, 2 }
 0x10d   : > { %1185 = vpow2.f32 %v729_v16  ;;  %v864_v26 = vsub.f32 %v1376_v22, %v857_v51  ;;  %v446_v3 = vmax.f32 %v444_v10, %v445_v17  ;;  %v581_v27 = vmax.f32 %v579_v11, %v580_v18 }
 0x10e   : > { %1187 = vpow2.f32 %v731_v20  ;;  %v865_v29 = vsub.f32 %v1381_v28, %v863_v21  ;;  %v452_v8 = vmax.f32 %v450_v14, %v451_v23  ;;  %v587_v39 = vmax.f32 %v585_v24, %v586_v30 }
 0x10f   : > { %v866_v31 = vmul.f32 1.442695, %v864_v26  ;;  %v453_v33 = vsub.f32 %v1384_v32, %v446_v3  ;;  %v582_v34 = vrot.slane %v581_v27, 1 }
 0x110   : > { %v868_v35 = vmul.f32 1.442695, %v865_v29  ;;  %v454_v37 = vsub.f32 %v1387_v36, %v452_v8  ;;  %v588_v42 = vrot.slane %v587_v39, 1 }
 0x111   : > { %1189 = vpow2.f32 %v866_v31  ;;  %v455_v40 = vmul.f32 1.442695, %v453_v33  ;;  %v583_v41 = vmax.f32 %v581_v27, %v582_v34 }
 0x112   : > { %1191 = vpow2.f32 %v868_v35  ;;  %v457_v22 = vmul.f32 1.442695, %v454_v37  ;;  %v589_v28 = vmax.f32 %v587_v39, %v588_v42 }
 0x113   : > { %1193 = vpow2.f32 %v455_v40  ;;  %v590_v43 = vsub.f32 %v576_v54, %v583_v41  ;;  %v246_v40 = vpop.permute.xlu0 %245 }
 0x114   : > { %1195 = vpow2.f32 %v457_v22  ;;  %v591_v46 = vsub.f32 %v577_v5, %v589_v28 }
 0x115   : > { %v592_v45 = vmul.f32 1.442695, %v590_v43 }
 0x116   : > { %v594_v48 = vmul.f32 1.442695, %v591_v46  ;;  %v251_v46 = vpop.permute.xlu1 %250 }
 0x117   : > { %v1407_v47 = vpop.eup %1185  ;;  %1197 = vpow2.f32 %v592_v45 }
 0x118   : > { %v1409_v32 = vpop.eup %1187  ;;  %v733_v36 = vrot.slane %v1407_v47, 4  ;;  %1199 = vpow2.f32 %v594_v48 }
 0x119   : > { %v739_v49 = vrot.slane %v1409_v32, 4 }
 0x11a   : > { %v734_v50 = vadd.f32 %v1407_v47, %v733_v36 }
 0x11b   : > { %v1414_v52 = vpop.eup %1189  ;;  %v740_v54 = vadd.f32 %v1409_v32, %v739_v49 }
 0x11c   : > { %v1417_v55 = vpop.eup %1191  ;;  %v735_v57 = vrot.slane %v734_v50, 2  ;;  %v870_v58 = vrot.slane %v1414_v52, 4 }
 0x11d   : > { %v1420_v59 = vpop.eup %1193  ;;  %v741_v60 = vrot.slane %v740_v54, 2  ;;  %v876_v61 = vrot.slane %v1417_v55, 4 }
 0x11e   : > { %v1423_v62 = vpop.eup %1195  ;;  %v736_v63 = vadd.f32 %v735_v57, %v734_v50  ;;  %v871_v0 = vadd.f32 %v1414_v52, %v870_v58  ;;  %v459_v2 = vrot.slane %v1420_v59, 4  ;;  %v256_v50 = vpop.permute.xlu0 %255 }
 0x11f   : > { %v742_v4 = vadd.f32 %v741_v60, %v740_v54  ;;  %v877_v5 = vadd.f32 %v1417_v55, %v876_v61  ;;  %v465_v7 = vrot.slane %v1423_v62, 4  ;;  %v427_v57 = vadd.f32 %v1373_v19, %v256_v50 }
 0x120   : > { %v737_v9 = vrot.slane %v736_v63, 1  ;;  %v872_v10 = vrot.slane %v871_v0, 2  ;;  %v460_v11 = vadd.f32 %v1420_v59, %v459_v2  ;;  %v429_v61 = vadd.f32 %v1378_v25, %v256_v50 }
 0x121   : > { %v1430_v12 = vpop.eup %1197  ;;  %v743_v13 = vrot.slane %v742_v4, 1  ;;  %v878_v14 = vrot.slane %v877_v5, 2  ;;  %v466_v15 = vadd.f32 %v1423_v62, %v465_v7 }
 0x122   : > { %v738_v16 = vadd.f32 %v737_v9, %v736_v63  ;;  %v873_v51 = vadd.f32 %v872_v10, %v871_v0  ;;  %v461_v17 = vrot.slane %v460_v11, 2  ;;  %v596_v18 = vrot.slane %v1430_v12, 4  ;;  %v1434_v24 = vpop.eup %1199 }
 0x123   : > { %v744_v20 = vadd.f32 %v743_v13, %v742_v4  ;;  %v879_v21 = vadd.f32 %v878_v14, %v877_v5  ;;  %v467_v23 = vrot.slane %v466_v15, 2  ;;  %v602_v30 = vrot.slane %v1434_v24, 4  ;;  %v261_v4 = vpop.permute.xlu1 %260 }
 0x124   : > { %1201 = vrcp.f32 %v738_v16  ;;  %v874_v26 = vrot.slane %v873_v51, 1  ;;  %v462_v3 = vadd.f32 %v461_v17, %v460_v11  ;;  %v597_v27 = vadd.f32 %v1430_v12, %v596_v18 }
 0x125   : > { %1203 = vrcp.f32 %v744_v20  ;;  %v880_v29 = vrot.slane %v879_v21, 1  ;;  %v468_v8 = vadd.f32 %v467_v23, %v466_v15  ;;  %v603_v39 = vadd.f32 %v1434_v24, %v602_v30 }
 0x126   : > { %v875_v31 = vadd.f32 %v874_v26, %v873_v51  ;;  %v463_v33 = vrot.slane %v462_v3, 1  ;;  %v598_v34 = vrot.slane %v597_v27, 2  ;;  %v433_v9 = vadd.f32 %v1389_v38, %v261_v4 }
 0x127   : > { %v881_v35 = vadd.f32 %v880_v29, %v879_v21  ;;  %v469_v37 = vrot.slane %v468_v8, 1  ;;  %v604_v43 = vrot.slane %v603_v39, 2  ;;  %v435_v19 = vadd.f32 %v1394_v44, %v261_v4 }
 0x128   : > { %1205 = vrcp.f32 %v875_v31  ;;  %v464_v41 = vadd.f32 %v463_v33, %v462_v3  ;;  %v599_v22 = vadd.f32 %v598_v34, %v597_v27  ;;  %v417_v15 = vadd.f32 %v1361_v56, %v246_v40 }
 0x129   : > { %1207 = vrcp.f32 %v881_v35  ;;  %v470_v42 = vadd.f32 %v469_v37, %v468_v8  ;;  %v605_v45 = vadd.f32 %v604_v43, %v603_v39  ;;  %v423_v20 = vadd.f32 %v1367_v6, %v251_v46 }
 0x12a   : > { %1209 = vrcp.f32 %v464_v41  ;;  %v600_v28 = vrot.slane %v599_v22, 1 }
 0x12b   : > { %1211 = vrcp.f32 %v470_v42  ;;  %v606_v48 = vrot.slane %v605_v45, 1 }
 0x12c   : > { %v601_v36 = vadd.f32 %v600_v28, %v599_v22 }
 0x12d   : > { %v607_v60 = vadd.f32 %v606_v48, %v605_v45 }
 0x12e   : > { %v1202_v49 = vpop.eup %1201  ;;  %1213 = vrcp.f32 %v601_v36 }
 0x12f   : > { %v1204_v54 = vpop.eup %1203  ;;  %v747_v58 = vmul.f32 %v1202_v49, %v1407_v47  ;;  %1215 = vrcp.f32 %v607_v60 }
 0x130   : > { %v748_v63 = vmul.f32 %v1204_v54, %v1409_v32  ;;  %v415_v32 = vadd.f32 %v1359_v53, %v246_v40 }
 0x131   : > { %v749_v0 = vmul.f32 %v747_v58, %v427_v57 }
 0x132   : > { %v1206_v2 = vpop.eup %1205  ;;  %v750_v5 = vmul.f32 %v748_v63, %v429_v61 }
 0x133   : > { %v1208_v7 = vpop.eup %1207  ;;  %v884_v10 = vmul.f32 %v1206_v2, %v1414_v52  ;;  %751 = vxpose.xlu0.b32.start.end [1/1] (short) %v749_v0, 128 }
 0x134   : > { %v1210_v11 = vpop.eup %1209  ;;  %v885_v47 = vmul.f32 %v1208_v7, %v1417_v55  ;;  %783 = vxpose.xlu1.b32.start.end [1/1] (short) %v750_v5, 128  ;;  %v421_v55 = vadd.f32 %v1363_v1, %v251_v46 }
 0x135   : > { %v1212_v25 = vpop.eup %1211  ;;  %v1448_v13 = vmul.f32 %v884_v10, %v433_v9  ;;  %v473_v14 = vmul.f32 %v1210_v11, %v1420_v59 }
 0x136   : > { %v1452_v38 = vmul.f32 %v885_v47, %v435_v19  ;;  %v474_v52 = vmul.f32 %v1212_v25, %v1423_v62 }
 0x137   : > { %v475_v16 = vmul.f32 %v473_v14, %v415_v32 }
 0x138   : > { %v1214_v51 = vpop.eup %1213  ;;  %v476_v44 = vmul.f32 %v474_v52, %v417_v15 }
 0x139   : > { %v610_v17 = vmul.f32 %v1214_v51, %v1430_v12  ;;  %v1216_v18 = vpop.eup %1215 }
 0x13a   : > { %v611_v59 = vmul.f32 %v1216_v18, %v1434_v24 }
 0x13b   : > { %v612_v53 = vmul.f32 %v610_v17, %v421_v55 }
 0x13c   : > { %v613_v21 = vmul.f32 %v611_v59, %v423_v20 }
 0x170   : > { %477 = vxpose.xlu0.b32.start.end [1/1] (short) %v475_v16, 128 }
 0x171   : > { %509 = vxpose.xlu1.b32.start.end [1/1] (short) %v476_v44, 128 }
 0x1ad   : > { %614 = vxpose.xlu0.b32.start.end [1/1] (short) %v612_v53, 128 }
 0x1ae   : > { %646 = vxpose.xlu1.b32.start.end [1/1] (short) %v613_v21, 128 }
 0x1b3   : > { %v767_v56 = vpop.trf.xlu0 }
 0x1b4   : > { %1093 = vst.msk [vmem:[%s1463_s19 + $0x200] sm:$0xff] %vm541_vm1, %v767_v56  ;;  %v799_v1 = vpop.trf.xlu1 }
 0x1b5   : > { %1109 = vst.msk [vmem:[%s1463_s19 + $0x280] sm:$0xff] %vm541_vm1, %v799_v1 }
 0x1b7   : > { %v768_v6 = vpop.trf.xlu0 }
 0x1b8   : > { %1094 = vst.msk [vmem:[%s1463_s19 + $0x208] sm:$0xff] %vm541_vm1, %v768_v6  ;;  %v800_v62 = vpop.trf.xlu1 }
 0x1b9   : > { %1110 = vst.msk [vmem:[%s1463_s19 + $0x288] sm:$0xff] %vm541_vm1, %v800_v62 }
 0x1bb   : > { %v769_v12 = vpop.trf.xlu0 }
 0x1bc   : > { %1095 = vst.msk [vmem:[%s1463_s19 + $0x210] sm:$0xff] %vm541_vm1, %v769_v12  ;;  %v801_v23 = vpop.trf.xlu1 }
 0x1bd   : > { %1111 = vst.msk [vmem:[%s1463_s19 + $0x290] sm:$0xff] %vm541_vm1, %v801_v23 }
 0x1bf   : > { %v770_v24 = vpop.trf.xlu0 }
 0x1c0   : > { %1096 = vst.msk [vmem:[%s1463_s19 + $0x218] sm:$0xff] %vm541_vm1, %v770_v24  ;;  %v802_v26 = vpop.trf.xlu1 }
 0x1c1   : > { %1112 = vst.msk [vmem:[%s1463_s19 + $0x298] sm:$0xff] %vm541_vm1, %v802_v26 }
 0x1c3   : > { %v771_v3 = vpop.trf.xlu0 }
 0x1c4   : > { %1097 = vst.msk [vmem:[%s1463_s19 + $0x220] sm:$0xff] %vm541_vm1, %v771_v3  ;;  %v803_v27 = vpop.trf.xlu1 }
 0x1c5   : > { %1113 = vst.msk [vmem:[%s1463_s19 + $0x2a0] sm:$0xff] %vm541_vm1, %v803_v27 }
 0x1c7   : > { %v772_v29 = vpop.trf.xlu0 }
 0x1c8   : > { %1098 = vst.msk [vmem:[%s1463_s19 + $0x228] sm:$0xff] %vm541_vm1, %v772_v29  ;;  %v804_v8 = vpop.trf.xlu1 }
 0x1c9   : > { %1114 = vst.msk [vmem:[%s1463_s19 + $0x2a8] sm:$0xff] %vm541_vm1, %v804_v8 }
 0x1cb   : > { %v773_v30 = vpop.trf.xlu0 }
 0x1cc   : > { %1099 = vst.msk [vmem:[%s1463_s19 + $0x230] sm:$0xff] %vm541_vm1, %v773_v30  ;;  %v805_v31 = vpop.trf.xlu1 }
 0x1cd   : > { %1115 = vst.msk [vmem:[%s1463_s19 + $0x2b0] sm:$0xff] %vm541_vm1, %v805_v31 }
 0x1cf   : > { %v774_v33 = vpop.trf.xlu0 }
 0x1d0   : > { %1100 = vst.msk [vmem:[%s1463_s19 + $0x238] sm:$0xff] %vm541_vm1, %v774_v33  ;;  %v806_v34 = vpop.trf.xlu1 }
 0x1d1   : > { %1116 = vst.msk [vmem:[%s1463_s19 + $0x2b8] sm:$0xff] %vm541_vm1, %v806_v34 }
 0x1d3   : > { %v775_v35 = vpop.trf.xlu0 }
 0x1d4   : > { %1101 = vst.msk [vmem:[%s1463_s19 + $0x240] sm:$0xff] %vm541_vm1, %v775_v35  ;;  %v807_v37 = vpop.trf.xlu1 }
 0x1d5   : > { %1117 = vst.msk [vmem:[%s1463_s19 + $0x2c0] sm:$0xff] %vm541_vm1, %v807_v37 }
 0x1d7   : > { %v776_v39 = vpop.trf.xlu0 }
 0x1d8   : > { %1102 = vst.msk [vmem:[%s1463_s19 + $0x248] sm:$0xff] %vm541_vm1, %v776_v39  ;;  %v808_v40 = vpop.trf.xlu1 }
 0x1d9   : > { %1118 = vst.msk [vmem:[%s1463_s19 + $0x2c8] sm:$0xff] %vm541_vm1, %v808_v40 }
 0x1db   : > { %v777_v41 = vpop.trf.xlu0 }
 0x1dc   : > { %1103 = vst.msk [vmem:[%s1463_s19 + $0x250] sm:$0xff] %vm541_vm1, %v777_v41  ;;  %v809_v22 = vpop.trf.xlu1 }
 0x1dd   : > { %1119 = vst.msk [vmem:[%s1463_s19 + $0x2d0] sm:$0xff] %vm541_vm1, %v809_v22 }
 0x1df   : > { %v778_v42 = vpop.trf.xlu0 }
 0x1e0   : > { %1104 = vst.msk [vmem:[%s1463_s19 + $0x258] sm:$0xff] %vm541_vm1, %v778_v42  ;;  %v810_v43 = vpop.trf.xlu1 }
 0x1e1   : > { %1120 = vst.msk [vmem:[%s1463_s19 + $0x2d8] sm:$0xff] %vm541_vm1, %v810_v43 }
 0x1e3   : > { %v779_v28 = vpop.trf.xlu0 }
 0x1e4   : > { %1105 = vst.msk [vmem:[%s1463_s19 + $0x260] sm:$0xff] %vm541_vm1, %v779_v28  ;;  %v811_v45 = vpop.trf.xlu1 }
 0x1e5   : > { %1121 = vst.msk [vmem:[%s1463_s19 + $0x2e0] sm:$0xff] %vm541_vm1, %v811_v45 }
 0x1e7   : > { %v780_v46 = vpop.trf.xlu0 }
 0x1e8   : > { %1106 = vst.msk [vmem:[%s1463_s19 + $0x268] sm:$0xff] %vm541_vm1, %v780_v46  ;;  %v812_v36 = vpop.trf.xlu1 }
 0x1e9   : > { %1122 = vst.msk [vmem:[%s1463_s19 + $0x2e8] sm:$0xff] %vm541_vm1, %v812_v36 }
 0x1eb   : > { %v781_v48 = vpop.trf.xlu0  ;;  %888 = vxpose.xlu0.b32.start.end [1/1] (short) %v1448_v13, 128 }
 0x1ec   : > { %1107 = vst.msk [vmem:[%s1463_s19 + $0x270] sm:$0xff] %vm541_vm1, %v781_v48  ;;  %v813_v49 = vpop.trf.xlu1  ;;  %920 = vxpose.xlu1.b32.start.end [1/1] (short) %v1452_v38, 128 }
 0x1ed   : > { %1123 = vst.msk [vmem:[%s1463_s19 + $0x2f0] sm:$0xff] %vm541_vm1, %v813_v49 }
 0x1ef   : > { %v782_v50 = vpop.trf.xlu0 }
 0x1f0   : > { %v814_v54 = vpop.trf.xlu1  ;;  %1108 = vst.msk [vmem:[%s1463_s19 + $0x278] sm:$0xff] %vm541_vm1, %v782_v50 }
 0x1f1   : > { %1124 = vst.msk [vmem:[%s1463_s19 + $0x2f8] sm:$0xff] %vm541_vm1, %v814_v54 }
 0x1f3   : > { %v493_v57 = vpop.trf.xlu0 }
 0x1f4   : > { %v525_v58 = vpop.trf.xlu1  ;;  %542 = vst.msk [vmem:[%s1463_s19] sm:$0xff] %vm541_vm1, %v493_v57 }
 0x1f5   : > { %558 = vst.msk [vmem:[%s1463_s19 + $0x80] sm:$0xff] %vm541_vm1, %v525_v58 }
 0x1f7   : > { %v494_v60 = vpop.trf.xlu0 }
 0x1f8   : > { %v526_v61 = vpop.trf.xlu1  ;;  %543 = vst.msk [vmem:[%s1463_s19 + $0x8] sm:$0xff] %vm541_vm1, %v494_v60 }
 0x1f9   : > { %559 = vst.msk [vmem:[%s1463_s19 + $0x88] sm:$0xff] %vm541_vm1, %v526_v61 }
 0x1fb   : > { %v495_v63 = vpop.trf.xlu0 }
 0x1fc   : > { %v527_v0 = vpop.trf.xlu1  ;;  %544 = vst.msk [vmem:[%s1463_s19 + $0x10] sm:$0xff] %vm541_vm1, %v495_v63 }
 0x1fd   : > { %560 = vst.msk [vmem:[%s1463_s19 + $0x90] sm:$0xff] %vm541_vm1, %v527_v0 }
 0x1ff   : > { %v496_v2 = vpop.trf.xlu0 }
 0x200   : > { %v528_v4 = vpop.trf.xlu1  ;;  %545 = vst.msk [vmem:[%s1463_s19 + $0x18] sm:$0xff] %vm541_vm1, %v496_v2 }
 0x201   : > { %561 = vst.msk [vmem:[%s1463_s19 + $0x98] sm:$0xff] %vm541_vm1, %v528_v4 }
 0x203   : > { %v497_v5 = vpop.trf.xlu0 }
 0x204   : > { %v529_v7 = vpop.trf.xlu1  ;;  %546 = vst.msk [vmem:[%s1463_s19 + $0x20] sm:$0xff] %vm541_vm1, %v497_v5 }
 0x205   : > { %562 = vst.msk [vmem:[%s1463_s19 + $0xa0] sm:$0xff] %vm541_vm1, %v529_v7 }
 0x207   : > { %v498_v9 = vpop.trf.xlu0 }
 0x208   : > { %v530_v10 = vpop.trf.xlu1  ;;  %547 = vst.msk [vmem:[%s1463_s19 + $0x28] sm:$0xff] %vm541_vm1, %v498_v9 }
 0x209   : > { %563 = vst.msk [vmem:[%s1463_s19 + $0xa8] sm:$0xff] %vm541_vm1, %v530_v10 }
 0x20b   : > { %v499_v11 = vpop.trf.xlu0 }
 0x20c   : > { %v531_v19 = vpop.trf.xlu1  ;;  %548 = vst.msk [vmem:[%s1463_s19 + $0x30] sm:$0xff] %vm541_vm1, %v499_v11 }
 0x20d   : > { %564 = vst.msk [vmem:[%s1463_s19 + $0xb0] sm:$0xff] %vm541_vm1, %v531_v19 }
 0x20f   : > { %v500_v47 = vpop.trf.xlu0 }
 0x210   : > { %v532_v25 = vpop.trf.xlu1  ;;  %549 = vst.msk [vmem:[%s1463_s19 + $0x38] sm:$0xff] %vm541_vm1, %v500_v47 }
 0x211   : > { %565 = vst.msk [vmem:[%s1463_s19 + $0xb8] sm:$0xff] %vm541_vm1, %v532_v25 }
 0x213   : > { %v501_v32 = vpop.trf.xlu0 }
 0x214   : > { %v533_v13 = vpop.trf.xlu1  ;;  %550 = vst.msk [vmem:[%s1463_s19 + $0x40] sm:$0xff] %vm541_vm1, %v501_v32 }
 0x215   : > { %566 = vst.msk [vmem:[%s1463_s19 + $0xc0] sm:$0xff] %vm541_vm1, %v533_v13 }
 0x217   : > { %v502_v14 = vpop.trf.xlu0 }
 0x218   : > { %v534_v15 = vpop.trf.xlu1  ;;  %551 = vst.msk [vmem:[%s1463_s19 + $0x48] sm:$0xff] %vm541_vm1, %v502_v14 }
 0x219   : > { %567 = vst.msk [vmem:[%s1463_s19 + $0xc8] sm:$0xff] %vm541_vm1, %v534_v15 }
 0x21b   : > { %v503_v38 = vpop.trf.xlu0 }
 0x21c   : > { %v535_v52 = vpop.trf.xlu1  ;;  %552 = vst.msk [vmem:[%s1463_s19 + $0x50] sm:$0xff] %vm541_vm1, %v503_v38 }
 0x21d   : > { %568 = vst.msk [vmem:[%s1463_s19 + $0xd0] sm:$0xff] %vm541_vm1, %v535_v52 }
 0x21f   : > { %v504_v16 = vpop.trf.xlu0 }
 0x220   : > { %v536_v51 = vpop.trf.xlu1  ;;  %553 = vst.msk [vmem:[%s1463_s19 + $0x58] sm:$0xff] %vm541_vm1, %v504_v16 }
 0x221   : > { %569 = vst.msk [vmem:[%s1463_s19 + $0xd8] sm:$0xff] %vm541_vm1, %v536_v51 }
 0x223   : > { %v505_v44 = vpop.trf.xlu0 }
 0x224   : > { %v537_v55 = vpop.trf.xlu1  ;;  %554 = vst.msk [vmem:[%s1463_s19 + $0x60] sm:$0xff] %vm541_vm1, %v505_v44 }
 0x225   : > { %570 = vst.msk [vmem:[%s1463_s19 + $0xe0] sm:$0xff] %vm541_vm1, %v537_v55 }
 0x227   : > { %v506_v17 = vpop.trf.xlu0 }
 0x228   : > { %v538_v18 = vpop.trf.xlu1  ;;  %555 = vst.msk [vmem:[%s1463_s19 + $0x68] sm:$0xff] %vm541_vm1, %v506_v17 }
 0x229   : > { %571 = vst.msk [vmem:[%s1463_s19 + $0xe8] sm:$0xff] %vm541_vm1, %v538_v18 }
 0x22b   : > { %v507_v53 = vpop.trf.xlu0 }
 0x22c   : > { %v539_v20 = vpop.trf.xlu1  ;;  %556 = vst.msk [vmem:[%s1463_s19 + $0x70] sm:$0xff] %vm541_vm1, %v507_v53 }
 0x22d   : > { %572 = vst.msk [vmem:[%s1463_s19 + $0xf0] sm:$0xff] %vm541_vm1, %v539_v20 }
 0x22f   : > { %v508_v59 = vpop.trf.xlu0 }
 0x230   : > { %v540_v21 = vpop.trf.xlu1  ;;  %557 = vst.msk [vmem:[%s1463_s19 + $0x78] sm:$0xff] %vm541_vm1, %v508_v59 }
 0x231   : > { %573 = vst.msk [vmem:[%s1463_s19 + $0xf8] sm:$0xff] %vm541_vm1, %v540_v21 }
 0x233   : > { %v630_v56 = vpop.trf.xlu0 }
 0x234   : > { %v662_v1 = vpop.trf.xlu1  ;;  %1061 = vst.msk [vmem:[%s1463_s19 + $0x100] sm:$0xff] %vm541_vm1, %v630_v56 }
 0x235   : > { %1077 = vst.msk [vmem:[%s1463_s19 + $0x180] sm:$0xff] %vm541_vm1, %v662_v1 }
 0x237   : > { %v631_v6 = vpop.trf.xlu0 }
 0x238   : > { %v663_v62 = vpop.trf.xlu1  ;;  %1062 = vst.msk [vmem:[%s1463_s19 + $0x108] sm:$0xff] %vm541_vm1, %v631_v6 }
 0x239   : > { %1078 = vst.msk [vmem:[%s1463_s19 + $0x188] sm:$0xff] %vm541_vm1, %v663_v62 }
 0x23b   : > { %v632_v12 = vpop.trf.xlu0 }
 0x23c   : > { %v664_v23 = vpop.trf.xlu1  ;;  %1063 = vst.msk [vmem:[%s1463_s19 + $0x110] sm:$0xff] %vm541_vm1, %v632_v12 }
 0x23d   : > { %1079 = vst.msk [vmem:[%s1463_s19 + $0x190] sm:$0xff] %vm541_vm1, %v664_v23 }
 0x23f   : > { %v633_v24 = vpop.trf.xlu0 }
 0x240   : > { %v665_v26 = vpop.trf.xlu1  ;;  %1064 = vst.msk [vmem:[%s1463_s19 + $0x118] sm:$0xff] %vm541_vm1, %v633_v24 }
 0x241   : > { %1080 = vst.msk [vmem:[%s1463_s19 + $0x198] sm:$0xff] %vm541_vm1, %v665_v26 }
 0x243   : > { %v634_v3 = vpop.trf.xlu0 }
 0x244   : > { %v666_v27 = vpop.trf.xlu1  ;;  %1065 = vst.msk [vmem:[%s1463_s19 + $0x120] sm:$0xff] %vm541_vm1, %v634_v3 }
 0x245   : > { %1081 = vst.msk [vmem:[%s1463_s19 + $0x1a0] sm:$0xff] %vm541_vm1, %v666_v27 }
 0x247   : > { %v635_v29 = vpop.trf.xlu0 }
 0x248   : > { %v667_v8 = vpop.trf.xlu1  ;;  %1066 = vst.msk [vmem:[%s1463_s19 + $0x128] sm:$0xff] %vm541_vm1, %v635_v29 }
 0x249   : > { %1082 = vst.msk [vmem:[%s1463_s19 + $0x1a8] sm:$0xff] %vm541_vm1, %v667_v8 }
 0x24b   : > { %v636_v30 = vpop.trf.xlu0 }
 0x24c   : > { %v668_v31 = vpop.trf.xlu1  ;;  %1067 = vst.msk [vmem:[%s1463_s19 + $0x130] sm:$0xff] %vm541_vm1, %v636_v30 }
 0x24d   : > { %1083 = vst.msk [vmem:[%s1463_s19 + $0x1b0] sm:$0xff] %vm541_vm1, %v668_v31 }
 0x24f   : > { %v637_v33 = vpop.trf.xlu0 }
 0x250   : > { %v669_v34 = vpop.trf.xlu1  ;;  %1068 = vst.msk [vmem:[%s1463_s19 + $0x138] sm:$0xff] %vm541_vm1, %v637_v33 }
 0x251   : > { %1084 = vst.msk [vmem:[%s1463_s19 + $0x1b8] sm:$0xff] %vm541_vm1, %v669_v34 }
 0x253   : > { %v638_v35 = vpop.trf.xlu0 }
 0x254   : > { %v670_v37 = vpop.trf.xlu1  ;;  %1069 = vst.msk [vmem:[%s1463_s19 + $0x140] sm:$0xff] %vm541_vm1, %v638_v35 }
 0x255   : > { %1085 = vst.msk [vmem:[%s1463_s19 + $0x1c0] sm:$0xff] %vm541_vm1, %v670_v37 }
 0x257   : > { %v639_v39 = vpop.trf.xlu0 }
 0x258   : > { %v671_v40 = vpop.trf.xlu1  ;;  %1070 = vst.msk [vmem:[%s1463_s19 + $0x148] sm:$0xff] %vm541_vm1, %v639_v39 }
 0x259   : > { %1086 = vst.msk [vmem:[%s1463_s19 + $0x1c8] sm:$0xff] %vm541_vm1, %v671_v40 }
 0x25b   : > { %v640_v41 = vpop.trf.xlu0 }
 0x25c   : > { %v672_v22 = vpop.trf.xlu1  ;;  %1071 = vst.msk [vmem:[%s1463_s19 + $0x150] sm:$0xff] %vm541_vm1, %v640_v41 }
 0x25d   : > { %1087 = vst.msk [vmem:[%s1463_s19 + $0x1d0] sm:$0xff] %vm541_vm1, %v672_v22 }
 0x25f   : > { %v641_v42 = vpop.trf.xlu0 }
 0x260   : > { %v673_v43 = vpop.trf.xlu1  ;;  %1072 = vst.msk [vmem:[%s1463_s19 + $0x158] sm:$0xff] %vm541_vm1, %v641_v42 }
 0x261   : > { %1088 = vst.msk [vmem:[%s1463_s19 + $0x1d8] sm:$0xff] %vm541_vm1, %v673_v43 }
 0x263   : > { %v642_v28 = vpop.trf.xlu0 }
 0x264   : > { %v674_v45 = vpop.trf.xlu1  ;;  %1073 = vst.msk [vmem:[%s1463_s19 + $0x160] sm:$0xff] %vm541_vm1, %v642_v28 }
 0x265   : > { %1089 = vst.msk [vmem:[%s1463_s19 + $0x1e0] sm:$0xff] %vm541_vm1, %v674_v45 }
 0x267   : > { %v643_v46 = vpop.trf.xlu0 }
 0x268   : > { %v675_v36 = vpop.trf.xlu1  ;;  %1074 = vst.msk [vmem:[%s1463_s19 + $0x168] sm:$0xff] %vm541_vm1, %v643_v46 }
 0x269   : > { %1090 = vst.msk [vmem:[%s1463_s19 + $0x1e8] sm:$0xff] %vm541_vm1, %v675_v36 }
 0x26b   : > { %v644_v48 = vpop.trf.xlu0 }
 0x26c   : > { %v676_v49 = vpop.trf.xlu1  ;;  %1075 = vst.msk [vmem:[%s1463_s19 + $0x170] sm:$0xff] %vm541_vm1, %v644_v48 }
 0x26d   : > { %1091 = vst.msk [vmem:[%s1463_s19 + $0x1f0] sm:$0xff] %vm541_vm1, %v676_v49 }
 0x26f   : > { %v645_v50 = vpop.trf.xlu0 }
 0x270   : > { %v677_v54 = vpop.trf.xlu1  ;;  %1076 = vst.msk [vmem:[%s1463_s19 + $0x178] sm:$0xff] %vm541_vm1, %v645_v50 }
 0x271   : > { %1092 = vst.msk [vmem:[%s1463_s19 + $0x1f8] sm:$0xff] %vm541_vm1, %v677_v54 }
 0x273   : > { %v904_v57 = vpop.trf.xlu0 }
 0x274   : > { %v936_v58 = vpop.trf.xlu1  ;;  %1125 = vst.msk [vmem:[%s1463_s19 + $0x300] sm:$0xff] %vm541_vm1, %v904_v57 }
 0x275   : > { %1141 = vst.msk [vmem:[%s1463_s19 + $0x380] sm:$0xff] %vm541_vm1, %v936_v58 }
 0x277   : > { %v905_v60 = vpop.trf.xlu0 }
 0x278   : > { %v937_v61 = vpop.trf.xlu1  ;;  %1126 = vst.msk [vmem:[%s1463_s19 + $0x308] sm:$0xff] %vm541_vm1, %v905_v60 }
 0x279   : > { %1142 = vst.msk [vmem:[%s1463_s19 + $0x388] sm:$0xff] %vm541_vm1, %v937_v61 }
 0x27b   : > { %v906_v63 = vpop.trf.xlu0 }
 0x27c   : > { %v938_v0 = vpop.trf.xlu1  ;;  %1127 = vst.msk [vmem:[%s1463_s19 + $0x310] sm:$0xff] %vm541_vm1, %v906_v63 }
 0x27d   : > { %1143 = vst.msk [vmem:[%s1463_s19 + $0x390] sm:$0xff] %vm541_vm1, %v938_v0 }
 0x27f   : > { %v907_v2 = vpop.trf.xlu0 }
 0x280   : > { %v939_v4 = vpop.trf.xlu1  ;;  %1128 = vst.msk [vmem:[%s1463_s19 + $0x318] sm:$0xff] %vm541_vm1, %v907_v2 }
 0x281   : > { %1144 = vst.msk [vmem:[%s1463_s19 + $0x398] sm:$0xff] %vm541_vm1, %v939_v4 }
 0x283   : > { %v908_v5 = vpop.trf.xlu0 }
 0x284   : > { %v940_v7 = vpop.trf.xlu1  ;;  %1129 = vst.msk [vmem:[%s1463_s19 + $0x320] sm:$0xff] %vm541_vm1, %v908_v5 }
 0x285   : > { %1145 = vst.msk [vmem:[%s1463_s19 + $0x3a0] sm:$0xff] %vm541_vm1, %v940_v7 }
 0x287   : > { %v909_v9 = vpop.trf.xlu0 }
 0x288   : > { %v941_v10 = vpop.trf.xlu1  ;;  %1130 = vst.msk [vmem:[%s1463_s19 + $0x328] sm:$0xff] %vm541_vm1, %v909_v9 }
 0x289   : > { %1146 = vst.msk [vmem:[%s1463_s19 + $0x3a8] sm:$0xff] %vm541_vm1, %v941_v10 }
 0x28b   : > { %v910_v11 = vpop.trf.xlu0 }
 0x28c   : > { %v942_v19 = vpop.trf.xlu1  ;;  %1131 = vst.msk [vmem:[%s1463_s19 + $0x330] sm:$0xff] %vm541_vm1, %v910_v11 }
 0x28d   : > { %1147 = vst.msk [vmem:[%s1463_s19 + $0x3b0] sm:$0xff] %vm541_vm1, %v942_v19 }
 0x28f   : > { %v911_v47 = vpop.trf.xlu0 }
 0x290   : > { %v943_v25 = vpop.trf.xlu1  ;;  %1132 = vst.msk [vmem:[%s1463_s19 + $0x338] sm:$0xff] %vm541_vm1, %v911_v47 }
 0x291   : > { %1148 = vst.msk [vmem:[%s1463_s19 + $0x3b8] sm:$0xff] %vm541_vm1, %v943_v25 }
 0x293   : > { %v912_v32 = vpop.trf.xlu0 }
 0x294   : > { %v944_v13 = vpop.trf.xlu1  ;;  %1133 = vst.msk [vmem:[%s1463_s19 + $0x340] sm:$0xff] %vm541_vm1, %v912_v32 }
 0x295   : > { %1149 = vst.msk [vmem:[%s1463_s19 + $0x3c0] sm:$0xff] %vm541_vm1, %v944_v13 }
 0x297   : > { %v913_v14 = vpop.trf.xlu0 }
 0x298   : > { %v945_v15 = vpop.trf.xlu1  ;;  %1134 = vst.msk [vmem:[%s1463_s19 + $0x348] sm:$0xff] %vm541_vm1, %v913_v14 }
 0x299   : > { %1150 = vst.msk [vmem:[%s1463_s19 + $0x3c8] sm:$0xff] %vm541_vm1, %v945_v15 }
 0x29b   : > { %v914_v38 = vpop.trf.xlu0 }
 0x29c   : > { %v946_v52 = vpop.trf.xlu1  ;;  %1135 = vst.msk [vmem:[%s1463_s19 + $0x350] sm:$0xff] %vm541_vm1, %v914_v38 }
 0x29d   : > { %1151 = vst.msk [vmem:[%s1463_s19 + $0x3d0] sm:$0xff] %vm541_vm1, %v946_v52 }
 0x29f   : > { %v915_v16 = vpop.trf.xlu0 }
 0x2a0   : > { %v947_v51 = vpop.trf.xlu1  ;;  %1136 = vst.msk [vmem:[%s1463_s19 + $0x358] sm:$0xff] %vm541_vm1, %v915_v16 }
 0x2a1   : > { %1152 = vst.msk [vmem:[%s1463_s19 + $0x3d8] sm:$0xff] %vm541_vm1, %v947_v51 }
 0x2a3   : > { %v916_v44 = vpop.trf.xlu0 }
 0x2a4   : > { %v948_v55 = vpop.trf.xlu1  ;;  %1137 = vst.msk [vmem:[%s1463_s19 + $0x360] sm:$0xff] %vm541_vm1, %v916_v44 }
 0x2a5   : > { %1153 = vst.msk [vmem:[%s1463_s19 + $0x3e0] sm:$0xff] %vm541_vm1, %v948_v55 }
 0x2a7   : > { %v917_v17 = vpop.trf.xlu0 }
 0x2a8   : > { %v949_v18 = vpop.trf.xlu1  ;;  %1138 = vst.msk [vmem:[%s1463_s19 + $0x368] sm:$0xff] %vm541_vm1, %v917_v17 }
 0x2a9   : > { %1154 = vst.msk [vmem:[%s1463_s19 + $0x3e8] sm:$0xff] %vm541_vm1, %v949_v18 }
 0x2ab   : > { %v918_v53 = vpop.trf.xlu0 }
 0x2ac   : > { %v950_v20 = vpop.trf.xlu1  ;;  %1139 = vst.msk [vmem:[%s1463_s19 + $0x370] sm:$0xff] %vm541_vm1, %v918_v53 }
 0x2ad   : > { %1155 = vst.msk [vmem:[%s1463_s19 + $0x3f0] sm:$0xff] %vm541_vm1, %v950_v20 }
 0x2af   : > { %v919_v59 = vpop.trf.xlu0 }
 0x2b0   : > { %v951_v21 = vpop.trf.xlu1  ;;  %1140 = vst.msk [vmem:[%s1463_s19 + $0x378] sm:$0xff] %vm541_vm1, %v919_v59 }
 0x2b1   : > { %1156 = vst.msk [vmem:[%s1463_s19 + $0x3f8] sm:$0xff] %vm541_vm1, %v951_v21 }
 0x2b2 PF: > { %s13_s12 = sadd.s32 1, %s1223_s12  }
 0x2b3   : > { %p10_p4 = scmp.ge.s32.totalorder %s13_s12, 4  }
 0x2b5   :  { %12 = sbr.rel (!%p10_p4) target bundleno = 1 (0x1), region = 65 }

</bundles_post_ra>
